<compile_context>
chip_gen: v5e
topology: v5e:2x2
jax: 0.10.0
libtpu: 0.0.40
codegen_flags: <defaults>
</compile_context>

<pallas_src>
import functools

import jax
import jax.numpy as jnp
from jax.experimental import pallas as pl
from jax.experimental.pallas import tpu as pltpu


def _round_up(a, b):
    return (a + b - 1) // b * b


def _pick_row_tile(Ho, Wo, tc, bytes_budget=2 * 1024 * 1024):
    """Largest divisor of Ho whose f32 output tile fits the budget; prefer >=2 blocks."""
    per_row = Wo * tc * 4
    max_rows = max(1, bytes_budget // per_row)
    divisors = [t for t in range(1, Ho + 1) if Ho % t == 0]
    fitting = [t for t in divisors if t <= max_rows]
    th = max(fitting) if fitting else 1
    if th == Ho and Ho > 1:
        # Prefer at least 2 grid steps along rows (pipelining / dual-TC sharding).
        th = max(t for t in divisors if t < Ho)
    return th


def _conv_relu_kernel(x_ref, w_ref, o_ref, acc_ref, *, stride, apply_relu):
    """One (batch, cout-tile, row-block) grid step.

    x_ref:   (1, Hp, Wp, Cin)        padded input, bf16, VMEM (full image, resident per batch)
    w_ref:   (KH, KW*Cin, Ct)        packed weight tile, bf16, VMEM
    o_ref:   (1, th, Wo, Ct)         output tile (lane-dense Ct), input dtype
    acc_ref: (th*Wo, Ct) float32     VMEM scratch accumulator
    """
    _, th, Wo, Ct = o_ref.shape
    Cin = x_ref.shape[-1]
    KH = w_ref.shape[0]
    KW = w_ref.shape[1] // Cin

    h = pl.program_id(2)
    row0 = h * (th * stride)

    for kh in range(KH):
        # Rows of the padded input needed for this tap (stride handled on the
        # major H axis of the ref load -> cheap).
        if stride == 1:
            rows = x_ref[0, pl.ds(row0 + kh, th), :, :]           # (th, Wp, Cin)
        else:
            rows = x_ref[0, pl.ds(row0 + kh, th, stride), :, :]   # (th, Wp, Cin)

        # Fold the KW taps into one contraction of depth KW*Cin.
        w_hi = lambda kw: kw + stride * (Wo - 1) + 1
        windows = [rows[:, kw:w_hi(kw):stride, :] for kw in range(KW)]
        patch = jnp.concatenate(windows, axis=-1)                 # (th, Wo, KW*Cin) bf16
        patch = patch.reshape(th * Wo, KW * Cin)

        contrib = jnp.dot(patch, w_ref[kh],
                          preferred_element_type=jnp.float32)     # (th*Wo, Ct) f32
        if kh == 0:
            acc_ref[...] = contrib
        else:
            acc_ref[...] += contrib

    acc = acc_ref[...]
    if apply_relu:
        acc = jnp.maximum(acc, 0.0)
    o_ref[0] = acc.reshape(th, Wo, Ct).astype(o_ref.dtype)


def conv_layer_pallas(x_nchw, weight_oihw, *, stride=1, activation="relu"):
    """Forward pass of ConvLayer (bias=False, padding=kernel_size//2, norm=None).

    x_nchw:      (N, Cin, H, W)      float32
    weight_oihw: (Cout, Cin, KH, KW) float32 (PyTorch layout)
    returns:     (N, Cout, Ho, Wo)   float32
    """
    assert activation in (None, "relu")
    N, Cin, H, W = x_nchw.shape
    Cout, Cin_w, KH, KW = weight_oihw.shape
    assert Cin == Cin_w and KH == KW

    pad = KH // 2
    Ho = (H + 2 * pad - KH) // stride + 1
    Wo = (W + 2 * pad - KW) // stride + 1
    Hp, Wp = H + 2 * pad, W + 2 * pad

    compute_dtype = jnp.bfloat16

    # --- input: NCHW -> NHWC, cast to bf16, zero-pad spatial dims (glue) ---
    x = jnp.transpose(x_nchw, (0, 2, 3, 1)).astype(compute_dtype)
    x = jnp.pad(x, ((0, 0), (pad, pad), (pad, pad), (0, 0)))

    # --- weight: (Cout,Cin,KH,KW) -> (KH, KW*Cin, Cout_pad), bf16, lane-dense Cout ---
    tc = 128
    Cout_pad = _round_up(Cout, tc)
    w = jnp.transpose(weight_oihw, (2, 3, 1, 0))                  # (KH, KW, Cin, Cout)
    if Cout_pad != Cout:
        w = jnp.pad(w, ((0, 0), (0, 0), (0, 0), (0, Cout_pad - Cout)))
    w = w.reshape(KH, KW * Cin, Cout_pad).astype(compute_dtype)

    n_cblk = Cout_pad // tc
    th = _pick_row_tile(Ho, Wo, tc)
    n_hblk = Ho // th

    kernel = functools.partial(_conv_relu_kernel, stride=stride,
                               apply_relu=(activation == "relu"))

    # VMEM budget estimate (double-buffered blocks + scratch); raise the scoped
    # limit only when needed (keeps v5e/v7x defaults untouched for small sizes).
    x_blk = Hp * Wp * Cin * 2
    w_blk = KH * (KW * Cin) * tc * 2
    o_blk = th * Wo * tc * 4
    acc_b = th * Wo * tc * 4
    vmem_est = 2 * (x_blk + w_blk + o_blk) + acc_b + (4 << 20)
    cp_kwargs = dict(dimension_semantics=("parallel", "parallel", "parallel"))
    if vmem_est > (32 << 20):
        cp_kwargs["vmem_limit_bytes"] = int(min(vmem_est, 100 << 20))

    cost = pl.CostEstimate(
        flops=2 * N * Ho * Wo * KH * KW * Cin * Cout_pad,
        transcendentals=0,
        bytes_accessed=x.size * 2 + w.size * 2 + N * Ho * Wo * Cout_pad * 4)

    out_nhwc = pl.pallas_call(
        kernel,
        out_shape=jax.ShapeDtypeStruct((N, Ho, Wo, Cout_pad), x_nchw.dtype),
        grid_spec=pltpu.PrefetchScalarGridSpec(
            num_scalar_prefetch=0,
            grid=(N, n_cblk, n_hblk),
            in_specs=[
                # Full padded image per batch element; index independent of (c, h)
                # so it stays VMEM-resident across those axes.
                pl.BlockSpec((1, Hp, Wp, Cin), lambda b, c, h: (b, 0, 0, 0)),
                # Packed weight, tiled over Cout lanes.
                pl.BlockSpec((KH, KW * Cin, tc), lambda b, c, h: (0, 0, c)),
            ],
            out_specs=pl.BlockSpec((1, th, Wo, tc), lambda b, c, h: (b, h, 0, c)),
            scratch_shapes=[pltpu.VMEM((th * Wo, tc), jnp.float32)],
        ),
        compiler_params=pltpu.CompilerParams(**cp_kwargs),
        cost_estimate=cost,
    )(x, w)

    # Drop Cout padding, NHWC -> NCHW (glue).
    out_nhwc = out_nhwc[..., :Cout]
    return jnp.transpose(out_nhwc, (0, 3, 1, 2))


def _reference(x_nchw, weight_oihw, stride, in_dtype):
    """lax.conv reference; in_dtype controls operand precision (f32 or bf16)."""
    pad_h = weight_oihw.shape[2] // 2
    pad_w = weight_oihw.shape[3] // 2
    out = jax.lax.conv_general_dilated(
        x_nchw.astype(in_dtype), weight_oihw.astype(in_dtype),
        window_strides=(stride, stride),
        padding=[(pad_h, pad_h), (pad_w, pad_w)],
        dimension_numbers=("NCHW", "OIHW", "NCHW"),
        preferred_element_type=jnp.float32)
    return jnp.maximum(out, 0.0)


if __name__ == "__main__":
    key = jax.random.PRNGKey(0)
    k1, k2 = jax.random.split(key)

    N, Cin, H, W = 2, 4, 16, 16
    Cout, K = 8, 3
    stride = 1

    x = jax.random.normal(k1, (N, Cin, H, W), dtype=jnp.float32)
    # Deterministic synthetic weights (PyTorch-style OIHW layout), bias=False.
    w_scale = 1.0 / (Cin * K * K) ** 0.5
    weight = jax.random.uniform(k2, (Cout, Cin, K, K),
                                minval=-w_scale, maxval=w_scale,
                                dtype=jnp.float32)

    out = conv_layer_pallas(x, weight, stride=stride, activation="relu")
    out = jax.block_until_ready(out)
    assert out.shape == (N, Cout, H, W)

    # Tight check against a bf16-operand / f32-accumulation reference (matches the
    # kernel's compute precision).
    ref_bf16 = _reference(x, weight, stride, jnp.bfloat16)
    assert jnp.allclose(out, ref_bf16, atol=1e-3, rtol=1e-3)

    # Loose sanity check against the full-f32 reference (bf16 rounding headroom).
    ref_f32 = _reference(x, weight, stride, jnp.float32)
    assert jnp.allclose(out, ref_f32, atol=5e-2, rtol=5e-2)

    print("KERNEL_OK")
</pallas_src>

<mosaic_0001>
module attributes {stable_mosaic.version = 11 : i64} {
  func.func @_conv_relu_kernel(%arg0: i32, %arg1: i32, %arg2: i32, %arg3: memref<1x18x18x4xbf16, #tpu.memory_space<vmem>>, %arg4: memref<3x12x128xbf16, #tpu.memory_space<vmem>>, %arg5: memref<1x8x16x128xf32, #tpu.memory_space<vmem>>, %arg6: memref<128x128xf32, #tpu.memory_space<vmem>>) attributes {dimension_semantics = [#tpu.dimension_semantics<parallel>, #tpu.dimension_semantics<parallel>, #tpu.dimension_semantics<parallel>], iteration_bounds = array<i64: 2, 1, 2>, scalar_prefetch = 0 : i64, scratch_operands = 1 : i64, tpu.core_type = #tpu.core_type<tc>, window_params = [{transform_indices = @transform_0, window_bounds = array<i64: 1, 18, 18, 4>}, {transform_indices = @transform_1, window_bounds = array<i64: 3, 12, 128>}, {transform_indices = @transform_2, window_bounds = array<i64: 1, 8, 16, 128>}]} {
    %c8_i32 = arith.constant 8 : i32
    %0 = arith.muli %arg2, %c8_i32 : i32
    %c0_i32 = arith.constant 0 : i32
    %1 = arith.addi %0, %c0_i32 : i32
    %c0 = arith.constant 0 : index
    %2 = arith.index_cast %1 : i32 to index
    %c0_0 = arith.constant 0 : index
    %c0_1 = arith.constant 0 : index
    %3 = vector.load %arg3[%c0, %2, %c0_0, %c0_1] : memref<1x18x18x4xbf16, #tpu.memory_space<vmem>>, vector<1x8x18x4xbf16>
    %4 = vector.shape_cast %3 : vector<1x8x18x4xbf16> to vector<8x18x4xbf16>
    %5 = vector.extract_strided_slice %4 {offsets = [0, 0, 0], sizes = [8, 16, 4], strides = [1, 1, 1]} : vector<8x18x4xbf16> to vector<8x16x4xbf16>
    %6 = vector.extract_strided_slice %4 {offsets = [0, 1, 0], sizes = [8, 16, 4], strides = [1, 1, 1]} : vector<8x18x4xbf16> to vector<8x16x4xbf16>
    %7 = vector.extract_strided_slice %4 {offsets = [0, 2, 0], sizes = [8, 16, 4], strides = [1, 1, 1]} : vector<8x18x4xbf16> to vector<8x16x4xbf16>
    %8 = tpu.concatenate %5, %6, %7 in 2 : vector<8x16x4xbf16>, vector<8x16x4xbf16>, vector<8x16x4xbf16> -> vector<8x16x12xbf16>
    %9 = vector.shape_cast %8 : vector<8x16x12xbf16> to vector<128x12xbf16>
    %c0_2 = arith.constant 0 : index
    %c0_3 = arith.constant 0 : index
    %c0_4 = arith.constant 0 : index
    %10 = vector.load %arg4[%c0_2, %c0_3, %c0_4] : memref<3x12x128xbf16, #tpu.memory_space<vmem>>, vector<1x12x128xbf16>
    %11 = vector.shape_cast %10 : vector<1x12x128xbf16> to vector<12x128xbf16>
    %cst = arith.constant dense<0.000000e+00> : vector<128x128xf32>
    %12 = tpu.matmul %9, %11, %cst {dimension_numbers = #tpu.dot_dimension_numbers<[1], [0], [0], [1], [0, 0, 1, 1], [], []>} : vector<128x12xbf16>, vector<12x128xbf16>, vector<128x128xf32> -> vector<128x128xf32>
    %c0_5 = arith.constant 0 : index
    %c0_6 = arith.constant 0 : index
    %13 = vector.load %arg6[%c0_5, %c0_6] : memref<128x128xf32, #tpu.memory_space<vmem>>, vector<128x128xf32>
    tpu.vector_store %arg6[%c0_5, %c0_6], %12 {strides = array<i32>} : memref<128x128xf32, #tpu.memory_space<vmem>>, vector<128x128xf32>,
    %c1_i32 = arith.constant 1 : i32
    %14 = arith.addi %0, %c1_i32 : i32
    %c0_7 = arith.constant 0 : index
    %15 = arith.index_cast %14 : i32 to index
    %c0_8 = arith.constant 0 : index
    %c0_9 = arith.constant 0 : index
    %16 = vector.load %arg3[%c0_7, %15, %c0_8, %c0_9] : memref<1x18x18x4xbf16, #tpu.memory_space<vmem>>, vector<1x8x18x4xbf16>
    %17 = vector.shape_cast %16 : vector<1x8x18x4xbf16> to vector<8x18x4xbf16>
    %18 = vector.extract_strided_slice %17 {offsets = [0, 0, 0], sizes = [8, 16, 4], strides = [1, 1, 1]} : vector<8x18x4xbf16> to vector<8x16x4xbf16>
    %19 = vector.extract_strided_slice %17 {offsets = [0, 1, 0], sizes = [8, 16, 4], strides = [1, 1, 1]} : vector<8x18x4xbf16> to vector<8x16x4xbf16>
    %20 = vector.extract_strided_slice %17 {offsets = [0, 2, 0], sizes = [8, 16, 4], strides = [1, 1, 1]} : vector<8x18x4xbf16> to vector<8x16x4xbf16>
    %21 = tpu.concatenate %18, %19, %20 in 2 : vector<8x16x4xbf16>, vector<8x16x4xbf16>, vector<8x16x4xbf16> -> vector<8x16x12xbf16>
    %22 = vector.shape_cast %21 : vector<8x16x12xbf16> to vector<128x12xbf16>
    %c1 = arith.constant 1 : index
    %c0_10 = arith.constant 0 : index
    %c0_11 = arith.constant 0 : index
    %23 = vector.load %arg4[%c1, %c0_10, %c0_11] : memref<3x12x128xbf16, #tpu.memory_space<vmem>>, vector<1x12x128xbf16>
    %24 = vector.shape_cast %23 : vector<1x12x128xbf16> to vector<12x128xbf16>
    %cst_12 = arith.constant dense<0.000000e+00> : vector<128x128xf32>
    %25 = tpu.matmul %22, %24, %cst_12 {dimension_numbers = #tpu.dot_dimension_numbers<[1], [0], [0], [1], [0, 0, 1, 1], [], []>} : vector<128x12xbf16>, vector<12x128xbf16>, vector<128x128xf32> -> vector<128x128xf32>
    %c0_13 = arith.constant 0 : index
    %c0_14 = arith.constant 0 : index
    %26 = vector.load %arg6[%c0_13, %c0_14] : memref<128x128xf32, #tpu.memory_space<vmem>>, vector<128x128xf32>
    %27 = arith.addf %26, %25 : vector<128x128xf32>
    %c0_15 = arith.constant 0 : index
    %c0_16 = arith.constant 0 : index
    %28 = vector.load %arg6[%c0_15, %c0_16] : memref<128x128xf32, #tpu.memory_space<vmem>>, vector<128x128xf32>
    tpu.vector_store %arg6[%c0_15, %c0_16], %27 {strides = array<i32>} : memref<128x128xf32, #tpu.memory_space<vmem>>, vector<128x128xf32>,
    %c2_i32 = arith.constant 2 : i32
    %29 = arith.addi %0, %c2_i32 : i32
    %c0_17 = arith.constant 0 : index
    %30 = arith.index_cast %29 : i32 to index
    %c0_18 = arith.constant 0 : index
    %c0_19 = arith.constant 0 : index
    %31 = vector.load %arg3[%c0_17, %30, %c0_18, %c0_19] : memref<1x18x18x4xbf16, #tpu.memory_space<vmem>>, vector<1x8x18x4xbf16>
    %32 = vector.shape_cast %31 : vector<1x8x18x4xbf16> to vector<8x18x4xbf16>
    %33 = vector.extract_strided_slice %32 {offsets = [0, 0, 0], sizes = [8, 16, 4], strides = [1, 1, 1]} : vector<8x18x4xbf16> to vector<8x16x4xbf16>
    %34 = vector.extract_strided_slice %32 {offsets = [0, 1, 0], sizes = [8, 16, 4], strides = [1, 1, 1]} : vector<8x18x4xbf16> to vector<8x16x4xbf16>
    %35 = vector.extract_strided_slice %32 {offsets = [0, 2, 0], sizes = [8, 16, 4], strides = [1, 1, 1]} : vector<8x18x4xbf16> to vector<8x16x4xbf16>
    %36 = tpu.concatenate %33, %34, %35 in 2 : vector<8x16x4xbf16>, vector<8x16x4xbf16>, vector<8x16x4xbf16> -> vector<8x16x12xbf16>
    %37 = vector.shape_cast %36 : vector<8x16x12xbf16> to vector<128x12xbf16>
    %c2 = arith.constant 2 : index
    %c0_20 = arith.constant 0 : index
    %c0_21 = arith.constant 0 : index
    %38 = vector.load %arg4[%c2, %c0_20, %c0_21] : memref<3x12x128xbf16, #tpu.memory_space<vmem>>, vector<1x12x128xbf16>
    %39 = vector.shape_cast %38 : vector<1x12x128xbf16> to vector<12x128xbf16>
    %cst_22 = arith.constant dense<0.000000e+00> : vector<128x128xf32>
    %40 = tpu.matmul %37, %39, %cst_22 {dimension_numbers = #tpu.dot_dimension_numbers<[1], [0], [0], [1], [0, 0, 1, 1], [], []>} : vector<128x12xbf16>, vector<12x128xbf16>, vector<128x128xf32> -> vector<128x128xf32>
    %c0_23 = arith.constant 0 : index
    %c0_24 = arith.constant 0 : index
    %41 = vector.load %arg6[%c0_23, %c0_24] : memref<128x128xf32, #tpu.memory_space<vmem>>, vector<128x128xf32>
    %42 = arith.addf %41, %40 : vector<128x128xf32>
    %c0_25 = arith.constant 0 : index
    %c0_26 = arith.constant 0 : index
    %43 = vector.load %arg6[%c0_25, %c0_26] : memref<128x128xf32, #tpu.memory_space<vmem>>, vector<128x128xf32>
    tpu.vector_store %arg6[%c0_25, %c0_26], %42 {strides = array<i32>} : memref<128x128xf32, #tpu.memory_space<vmem>>, vector<128x128xf32>,
    %c0_27 = arith.constant 0 : index
    %c0_28 = arith.constant 0 : index
    %44 = vector.load %arg6[%c0_27, %c0_28] : memref<128x128xf32, #tpu.memory_space<vmem>>, vector<128x128xf32>
    %cst_29 = arith.constant 0.000000e+00 : f32
    %45 = vector.broadcast %cst_29 : f32 to vector<128x128xf32>
    %46 = arith.maximumf %44, %45 : vector<128x128xf32>
    %47 = vector.shape_cast %46 : vector<128x128xf32> to vector<8x16x128xf32>
    %c0_30 = arith.constant 0 : index
    %c0_31 = arith.constant 0 : index
    %c0_32 = arith.constant 0 : index
    %c0_33 = arith.constant 0 : index
    %48 = vector.load %arg5[%c0_30, %c0_31, %c0_32, %c0_33] : memref<1x8x16x128xf32, #tpu.memory_space<vmem>>, vector<1x8x16x128xf32>
    %49 = vector.shape_cast %48 : vector<1x8x16x128xf32> to vector<8x16x128xf32>
    %50 = vector.shape_cast %47 : vector<8x16x128xf32> to vector<1x8x16x128xf32>
    tpu.vector_store %arg5[%c0_30, %c0_31, %c0_32, %c0_33], %50 {strides = array<i32>} : memref<1x8x16x128xf32, #tpu.memory_space<vmem>>, vector<1x8x16x128xf32>,
    return
  }
  func.func @transform_0(%arg0: i32, %arg1: i32, %arg2: i32) -> (i32, i32, i32, i32) {
    %c0_i32 = arith.constant 0 : i32
    %c0_i32_0 = arith.constant 0 : i32
    %c0_i32_1 = arith.constant 0 : i32
    %c0_i32_2 = arith.constant 0 : i32
    return %arg0, %c0_i32, %c0_i32_0, %c0_i32_1 : i32, i32, i32, i32
  }
  func.func @transform_1(%arg0: i32, %arg1: i32, %arg2: i32) -> (i32, i32, i32) {
    %c0_i32 = arith.constant 0 : i32
    %c0_i32_0 = arith.constant 0 : i32
    %c0_i32_1 = arith.constant 0 : i32
    return %c0_i32, %c0_i32_0, %arg1 : i32, i32, i32
  }
  func.func @transform_2(%arg0: i32, %arg1: i32, %arg2: i32) -> (i32, i32, i32, i32) {
    %c0_i32 = arith.constant 0 : i32
    %c0_i32_0 = arith.constant 0 : i32
    return %arg0, %arg2, %c0_i32, %arg1 : i32, i32, i32, i32
  }
}

</mosaic_0001>

<bundles_post_ra>
// kernel: tpu_custom_call.1
= control target key start
LH: loop header
LB: loop body
LE: loop exit
PB: predicated region body
PF: predicated region fallthrough
CT: control target
= control target key end

     0   :  { %7 = vsyncpa [#allocation4], 0  ;;  %s2525_s0 = inlined_call_operand.vmem [shape: bf16[2,18,18,4], index: 0, kind: input, shape index: {}]   ;;  %s2526_s1 = inlined_call_operand.vmem [shape: bf16[3,12,128], index: 1, kind: input, shape index: {}]   ;;  %s2527_s2 = inlined_call_operand.hbm [shape: f32[2,16,16,128], index: 2, kind: output, shape index: {}]  }
   0x1   :  { %9 = vsyncpa [#allocation4 + $0x1], 0  ;;  %s1957_s9 = smov 0   ;;  %s1959_s10 = smov 0  }
   0x2   :  { %s1961_s11 = smov 0   ;;  %s1963_s12 = smov 0  }
   0x3   :  { %s1965_s13 = smov 0   ;;  %s1967_s14 = smov 0  }
   0x4   :  { %s1969_s15 = smov 0   ;;  %s1971_s16 = smov 0  }
   0x5 LB: > { %s1530_s17 = sadd.s32 4294967295, %s1937_s16   ;;  %s1531_s18 = sadd.s32 4294967294, %s1937_s16   ;;  %s1937_s16 = sphi %s1971_s16, %s15_s16   ;;  %s1933_s15 = sphi %s1969_s15, %s2536_s15   ;;  %s1929_s14 = sphi %s1967_s14, %s2535_s14   ;;  %s1925_s13 = sphi %s1965_s13, %s2534_s13   ;;  %s1921_s12 = sphi %s1963_s12, %s2533_s12   ;;  %s1917_s11 = sphi %s1961_s11, %s2532_s11   ;;  %s1913_s10 = sphi %s1959_s10, %s2531_s10   ;;  %s1909_s9 = sphi %s1957_s9, %s2530_s9  }
   0x6   : > { %s27_s19 = sadd.s32 1, %s1929_s14  ;;  %s34_s20 = sadd.s32 1, %s1933_s15 }
   0x7   : > { %p28_p0 = scmp.ge.s32.totalorder %s27_s19, 2  ;;  %p107_p1 = scmp.ne.s32.totalorder %s1917_s11, %s1913_s10 }
   0x8   : > { %p108_p2 = scmp.eq.s32.totalorder %s1530_s17, 3  ;;  %p113_p5 = scmp.ne.s32.totalorder %s1913_s10, %s1909_s9 }
   0x9   : > { %s2538_s19 = smov (%p28_p0, %s27_s19), 0  ;;  %s2540_s20 = smov (!%p28_p0, %s34_s20), %s1933_s15 }
   0xa   : > { %s91_s21 = ssub.s32 %s1929_s14, %s2538_s19  ;;  %p2008_p3 = por %p108_p2, %p107_p1 }
   0xb   : > { %p36_p4 = scmp.ge.s32.totalorder %s2540_s20, 2  ;;  %p114_p6 = scmp.eq.s32.totalorder %s1531_s18, 3 }
   0xc   : > { %p1535_p7 = scmp.ge.s32.totalorder %s1937_s16, 1  ;;  %p147_p9 = scmp.lt.s32.totalorder %s1937_s16, 5 }
   0xd   : > { %s2542_s20 = smov (%p36_p4, %s2540_s20), 0  ;;  %p2017_p8 = por %p114_p6, %p113_p5 }
   0xe   : > { %s90_s24 = ssub.s32 %s1933_s15, %s2542_s20  ;;  %s97_s25 = sadd.s32 1, %s1917_s11 }
   0xf   : > { %s92_s26 = sor.u32 %s91_s21, %s90_s24  ;;  %p148_p10 = pnand %p1535_p7, %p147_p9 }
  0x10   : > { %p95_p11 = scmp.eq.s32.totalorder %s92_s26, 0  ;;  %p173_p12 = scmp.lt.s32.totalorder (!%p148_p10), %s1925_s13, 1 }
  0x11   : > { %151 = sbr.rel (%p148_p10) target bundleno = 418 (0x1a2), region = 28  ;;  %s1939_s7 = smov (!%p148_p10), 8  }
  0x12   : > { %s2026_s27 = scalar_select %p95_p11, %s1917_s11, %s97_s25  }
  0x13   : > { %s1736_s29 = smul.u32 (!%p148_p10), 96, %s1921_s12  ;;  %s1940_s8 = smov (!%p148_p10), 4  }
  0x14   : > { %s1764_s18 = sshll.u32 (!%p148_p10), %s1921_s12, 4  ;;  %s1732_s21 = sshll.u32 (!%p148_p10), %s1925_s13, 5 }
  0x15   : > { %s1419_s24 = sadd.s32 (!%p148_p10), %s1764_s18, %s1732_s21  ;;  %s1863_s18 = scalar_lea.hbm (!%p148_p10), %s2527_s2, 512 }
  0x16   : > { %s174_s28 = scalar_select %p173_p12, %s1925_s13, 1  ;;  %vm389_vm0 = vcmask 1046528   ;;  %vm276_vm1 = vsmask.f32 7424  ;;  %vm488_vm2 = vcmask 1045504   ;;  %vm430_vm3 = vcmask 31744  }
  0x17   : > { %vm447_vm4 = vcmask 64512   ;;  %vm471_vm5 = vcmask 97280   ;;  %s1733_s25 = sshll.u32 %s1419_s24, 3 }
  0x18   : > { %s1768_s30 = smul.u32 216, %s174_s28  ;;  %s1421_s26 = scalar_lea.hbm %s2527_s2, %s1733_s25 }
  0x1a   : > { %s177_s5 = scalar_lea.vmem %s2525_s0, %s1768_s30 }
  0x1b   : > { %s2034_s6 = scalar_lea.vmem %s177_s5, %s1736_s29  ;;  %s1424_s29 = sshll.u32 %s1421_s26, 4  ;;  %s1425_s29 = int_to_ptr.hbm [resolvable:$true] %s1424_s29 }
  0x1c   : > { %v2037_v0 = vld [vmem:[%s2034_s6 + $0x48] sm:$0xff]  ;;  %v208_v1 = vld [vmem:[%s2034_s6 + $0x50] sm:$0x1]  ;;  %v2041_v2 = vld [vmem:[%s2034_s6] sm:$0xff]  ;;  %s1857_s3 = sshra.s32 %s1425_s29, 4  ;;  %s1858_s3 = int_to_ptr.hbm [resolvable:$true] %s1857_s3 }
  0x1d   : > { %v266_v3 = vunpack.c.l.b16 %v208_v1  ;;  %v190_v4 = vld [vmem:[%s2034_s6 + $0x8] sm:$0x1]  ;;  %v1661_v5 = vld [vmem:[%s2034_s6 + $0x20] sm:$0x1]  ;;  %v408_v9 = vrot.slane %v2037_v0, 1  ;;  %v352_v10 = vshll.u32 %v2037_v0, 16  ;;  %p1864_p2 = scmp.lt.s32.totalorder %s1858_s3, %s2527_s2 }
  0x1e   : > { %v260_v6 = vunpack.c.l.b16 %v190_v4  ;;  %v1033_v7 = vunpack.c.l.b16 %v1661_v5  ;;  %v390_v12 = vrot.slane %v2041_v2, 1  ;;  %v2049_v13 = vld [vmem:[%s2034_s6 + $0x18] sm:$0xff]  ;;  %v1589_v16 = vld [vmem:[%s2034_s6 + $0x14] sm:$0x1]  ;;  %v350_v18 = vshrl.u32 %v2037_v0, 16  ;;  %v2063_v34 = vld [vmem:[%s2034_s6 + $0xc] sm:$0xff] }
  0x1f   : > { %v274_v8 = vpack.c.b16 %v266_v3, %v266_v3  ;;  %v354_v19 = vrot.slane %v352_v10, 1  ;;  %v1161_v23 = vrot.slane %v2049_v13, 1  ;;  %v633_v24 = vunpack.c.l.b16 %v1589_v16  ;;  %v1664_v33 = vld [vmem:[%s2034_s6 + $0x2c] sm:$0x1]  ;;  %v211_v42 = vld [vmem:[%s2034_s6 + $0x5c] sm:$0x1] }
  0x20   : > { %v268_v11 = vpack.c.b16 %v260_v6, %v260_v6  ;;  %v1041_v15 = vpack.c.b16 %v1033_v7, %v1033_v7  ;;  %v1052_v26 = vshll.u32 %v2049_v13, 16  ;;  %v278_v27 = vshrl.u32 %v2041_v2, 16  ;;  %v2069_v43 = vld [vmem:[%s2034_s6 + $0x24] sm:$0xff]  ;;  %v1592_v54 = vld [vmem:[%s2034_s6 + $0x20] sm:$0x1]  ;;  %v2085_v59 = vld [vmem:[%s2034_s6 + $0x54] sm:$0xff] }
  0x21   : > { %v409_v14 = vrot.slane %v274_v8, 1  ;;  %v357_v20 = vshll.u32 %v274_v8, 16  ;;  %v280_v28 = vshll.u32 %v2041_v2, 16  ;;  %v355_v29 = vor.u32 %v354_v19, %v350_v18  ;;  %v193_v58 = vld [vmem:[%s2034_s6 + $0x14] sm:$0x1]  ;;  %v2090_v4 = vld [vmem:[%s2034_s6 + $0x18] sm:$0xff] }
  0x22   : > { %v391_v17 = vrot.slane %v268_v11, 1  ;;  %v1162_v25 = vrot.slane %v1041_v15, 1  ;;  %v285_v31 = vshll.u32 %v268_v11, 16  ;;  %v641_v35 = vpack.c.b16 %v633_v24, %v633_v24  ;;  %v2095_v8 = vld [vmem:[%s2034_s6 + $0xc] sm:$0xff]  ;;  %s1859_s4 = scalar_lea.hbm %s1858_s3, 128 }
  0x23   : > { %v410_v21 = vsel %vm389_vm0, %v408_v9, %v409_v14  ;;  %v359_v30 = vrot.slane %v357_v20, 1  ;;  %v282_v32 = vrot.slane %v280_v28, 1  ;;  %v1050_v36 = vshrl.u32 %v2049_v13, 16  ;;  %p1860_p13 = scmp.ne.s32.totalorder %s1858_s3, %s1859_s4  ;;  %p1865_p4 = scmp.lt.s32.totalorder %s1863_s18, %s1859_s4 }
  0x24   : > { %426 = vrot.lane.b32.xlu1 %v410_v21, %s1939_s7  ;;  %v392_v22 = vsel %vm389_vm0, %v390_v12, %v391_v17  ;;  %v287_v37 = vrot.slane %v285_v31, 1  ;;  %v1163_v38 = vsel %vm389_vm0, %v1161_v23, %v1162_v25  ;;  %v1054_v39 = vrot.slane %v1052_v26, 1  ;;  %v1607_v25 = vld [vmem:[%s2034_s6 + $0x5c] sm:$0x1] }
  0x25   : > { %414 = vrot.lane.b32.xlu0 %v392_v22, %s1939_s7  ;;  %v1057_v40 = vshll.u32 %v1041_v15, 16  ;;  %v283_v41 = vor.u32 %v282_v32, %v278_v27  ;;  %v360_v44 = vsel %vm276_vm1, %v355_v29, %v359_v30  ;;  %v1034_v45 = vunpack.c.l.b16 %v1664_v33  ;;  %v2111_v33 = vld [vmem:[%s2034_s6 + $0x54] sm:$0xff]  ;;  %p1861_p0 = pnand %p1860_p13, %p2008_p3  ;;  %p1866_p5 = por %p1865_p4, %p1864_p2 }
  0x26   : > { %v761_v47 = vrot.slane %v2063_v34, 1  ;;  %v267_v48 = vunpack.c.l.b16 %v211_v42  ;;  %v762_v49 = vrot.slane %v641_v35, 1  ;;  %v1055_v50 = vor.u32 %v1054_v39, %v1050_v36 }
  0x27   : > { %v288_v46 = vsel %vm276_vm1, %v283_v41, %v287_v37  ;;  %v1059_v51 = vrot.slane %v1057_v40, 1  ;;  %v1064_v52 = vshll.u32 %v2069_v43, 16  ;;  %v2078_v53 = vpack.c.b16 %v1034_v45, %v1034_v45  ;;  %p1862_p1 = pneg %p1861_p0 }
  0x28   : > { %373 = vrot.lane.b32.xlu2 %v288_v46, %s1940_s8  ;;  %v650_v55 = vshrl.u32 %v2063_v34, 16  ;;  %v652_v56 = vshll.u32 %v2063_v34, 16  ;;  %v657_v57 = vshll.u32 %v641_v35, 16  ;;  %v275_v60 = vpack.c.b16 %v267_v48, %v267_v48 }
  0x29   : > { %v763_v63 = vsel %vm389_vm0, %v761_v47, %v762_v49  ;;  %v1062_v1 = vshrl.u32 %v2069_v43, 16  ;;  %v1066_v3 = vrot.slane %v1064_v52, 1  ;;  %v634_v5 = vunpack.c.l.b16 %v1592_v54  ;;  %v1667_v54 = vld [vmem:[%s2034_s6 + $0x38] sm:$0x1]  ;;  %p1867_p6 = pnand %p1866_p5, %p1862_p1 }
  0x2a   : > { %v654_v61 = vrot.slane %v652_v56, 1  ;;  %v659_v62 = vrot.slane %v657_v57, 1  ;;  %v1060_v6 = vsel %vm276_vm1, %v1055_v50, %v1059_v51  ;;  %v1069_v7 = vshll.u32 %v2078_v53, 16  ;;  %v2128_v57 = vld [vmem:[%s2034_s6 + $0x30] sm:$0xff] }
  0x2b   : > { %v261_v9 = vunpack.c.l.b16 %v193_v58  ;;  %v362_v11 = vshrl.u32 %v2085_v59, 16  ;;  %v364_v12 = vshll.u32 %v2085_v59, 16  ;;  %v411_v14 = vrot.slane %v2085_v59, 1 }
  0x2c   : > { %1185 = vrot.lane.b32.xlu1 %v1163_v38, %s1939_s7  ;;  %v655_v10 = vor.u32 %v654_v61, %v650_v55  ;;  %v412_v15 = vrot.slane %v275_v60, 1  ;;  %v369_v17 = vshll.u32 %v275_v60, 16  ;;  %v1067_v18 = vor.u32 %v1066_v3, %v1062_v1 }
  0x2d   : > { %385 = vrot.lane.b32.xlu0 %v360_v44, %s1940_s8  ;;  %v642_v19 = vpack.c.b16 %v634_v5, %v634_v5  ;;  %v664_v20 = vshll.u32 %v2090_v4, 16  ;;  %v366_v21 = vrot.slane %v364_v12, 1  ;;  %v1071_v22 = vrot.slane %v1069_v7, 1 }
  0x2e   : > { %v660_v16 = vsel %vm276_vm1, %v655_v10, %v659_v62  ;;  %v269_v23 = vpack.c.b16 %v261_v9, %v261_v9  ;;  %v292_v24 = vshll.u32 %v2095_v8, 16  ;;  %v371_v26 = vrot.slane %v369_v17, 1  ;;  %v196_v10 = vld [vmem:[%s2034_s6 + $0x20] sm:$0x1] }
  0x2f   : > { %v367_v27 = vor.u32 %v366_v21, %v362_v11  ;;  %v662_v28 = vshrl.u32 %v2090_v4, 16  ;;  %v290_v29 = vshrl.u32 %v2095_v8, 16  ;;  %v413_v30 = vsel %vm389_vm0, %v411_v14, %v412_v15  ;;  %v2140_v11 = vld [vmem:[%s2034_s6 + $0x24] sm:$0xff] }
  0x30   : > { %745 = vrot.lane.b32.xlu2 %v660_v16, %s1940_s8  ;;  %v666_v31 = vrot.slane %v664_v20, 1  ;;  %v669_v32 = vshll.u32 %v642_v19, 16  ;;  %v639_v35 = vunpack.c.l.b16 %v1607_v25  ;;  %v1072_v36 = vsel %vm276_vm1, %v1067_v18, %v1071_v22  ;;  %v2148_v22 = vld [vmem:[%s2034_s6 + $0x18] sm:$0xff] }
  0x31   : > { %v294_v37 = vrot.slane %v292_v24, 1  ;;  %v297_v38 = vshll.u32 %v269_v23, 16  ;;  %v372_v39 = vsel %vm276_vm1, %v367_v27, %v371_v26  ;;  %v724_v44 = vshll.u32 %v2111_v33, 16  ;;  %v1670_v26 = vld [vmem:[%s2034_s6 + $0x44] sm:$0x1] }
  0x32   : > { %v667_v40 = vor.u32 %v666_v31, %v662_v28  ;;  %v671_v41 = vrot.slane %v669_v32, 1  ;;  %v647_v42 = vpack.c.b16 %v639_v35, %v639_v35  ;;  %v1164_v47 = vrot.slane %v2069_v43, 1  ;;  %v1610_v27 = vld [vmem:[%s2034_s6 + $0x68] sm:$0x1] }
  0x33   : > { %v295_v45 = vor.u32 %v294_v37, %v290_v29  ;;  %v299_v46 = vrot.slane %v297_v38, 1  ;;  %v1165_v48 = vrot.slane %v2078_v53, 1  ;;  %v722_v50 = vshrl.u32 %v2111_v33, 16 }
  0x34   : > { %785 = vrot.lane.b32.xlu1 %v763_v63, %s1939_s7  ;;  %v672_v49 = vsel %vm276_vm1, %v667_v40, %v671_v41  ;;  %v726_v51 = vrot.slane %v724_v44, 1  ;;  %v729_v52 = vshll.u32 %v647_v42, 16  ;;  %v1035_v58 = vunpack.c.l.b16 %v1667_v54  ;;  %v1595_v63 = vld [vmem:[%s2034_s6 + $0x2c] sm:$0x1] }
  0x35   : > { %1145 = vrot.lane.b32.xlu0 %v1060_v6, %s1940_s8  ;;  %v300_v55 = vsel %vm276_vm1, %v295_v45, %v299_v46  ;;  %v1166_v56 = vsel %vm389_vm0, %v1164_v47, %v1165_v48  ;;  %v764_v61 = vrot.slane %v2090_v4, 1  ;;  %v765_v62 = vrot.slane %v642_v19, 1 }
  0x36   : > { %v727_v53 = vor.u32 %v726_v51, %v722_v50  ;;  %v731_v60 = vrot.slane %v729_v52, 1  ;;  %v393_v1 = vrot.slane %v2095_v8, 1  ;;  %v394_v3 = vrot.slane %v269_v23, 1 }
  0x37   : > { %v1076_v5 = vshll.u32 %v2128_v57, 16  ;;  %v1043_v6 = vpack.c.b16 %v1035_v58, %v1035_v58  ;;  %v766_v9 = vsel %vm389_vm0, %v764_v61, %v765_v62  ;;  %v635_v12 = vunpack.c.l.b16 %v1595_v63  ;;  %v199_v58 = vld [vmem:[%s2034_s6 + $0x2c] sm:$0x1] }
  0x38   : > { %387 = vrot.lane.b32.xlu2 %v372_v39, %s1940_s8  ;;  %v732_v7 = vsel %vm276_vm1, %v727_v53, %v731_v60  ;;  %v395_v14 = vsel %vm389_vm0, %v393_v1, %v394_v3  ;;  %v1074_v15 = vshrl.u32 %v2128_v57, 16  ;;  %v1167_v18 = vrot.slane %v2128_v57, 1  ;;  %v2163_v39 = vld [vmem:[%s2034_s6 + $0x3c] sm:$0xff] }
  0x39   : > { %v1078_v16 = vrot.slane %v1076_v5, 1  ;;  %v1081_v17 = vshll.u32 %v1043_v6, 16  ;;  %v1168_v19 = vrot.slane %v1043_v6, 1  ;;  %v779_v20 = vrot.slane %v2111_v33, 1  ;;  %v2181_v5 = vld [vmem:[%s2034_s6 + $0x24] sm:$0xff] }
  0x3a   : > { %v780_v21 = vrot.slane %v647_v42, 1  ;;  %v262_v23 = vunpack.c.l.b16 %v196_v10  ;;  %v2151_v24 = vpack.c.b16 %v635_v12, %v635_v12  ;;  %v676_v25 = vshll.u32 %v2140_v11, 16  ;;  %v2166_v42 = vld [vmem:[%s2034_s6 + $0x60] sm:$0xff] }
  0x3b   : > { %v1079_v28 = vor.u32 %v1078_v16, %v1074_v15  ;;  %v1083_v29 = vrot.slane %v1081_v17, 1  ;;  %v1169_v31 = vsel %vm389_vm0, %v1167_v18, %v1168_v19  ;;  %v1036_v40 = vunpack.c.l.b16 %v1670_v26 }
  0x3c   : > { %428 = vrot.lane.b32.xlu1 %v413_v30, %s1939_s7  ;;  %v304_v30 = vshll.u32 %v2148_v22, 16  ;;  %v781_v32 = vsel %vm389_vm0, %v779_v20, %v780_v21  ;;  %v270_v35 = vpack.c.b16 %v262_v23, %v262_v23  ;;  %v678_v37 = vrot.slane %v676_v25, 1 }
  0x3d   : > { %1147 = vrot.lane.b32.xlu0 %v1072_v36, %s1940_s8  ;;  %v674_v36 = vshrl.u32 %v2140_v11, 16  ;;  %v681_v38 = vshll.u32 %v2151_v24, 16  ;;  %v640_v41 = vunpack.c.l.b16 %v1610_v27  ;;  %v1084_v44 = vsel %vm276_vm1, %v1079_v28, %v1083_v29  ;;  %v1598_v28 = vld [vmem:[%s2034_s6 + $0x38] sm:$0x1] }
  0x3e   : > { %v302_v45 = vshrl.u32 %v2148_v22, 16  ;;  %v306_v46 = vrot.slane %v304_v30, 1  ;;  %v309_v47 = vshll.u32 %v270_v35, 16  ;;  %v396_v48 = vrot.slane %v2148_v22, 1 }
  0x3f   : > { %v679_v50 = vor.u32 %v678_v37, %v674_v36  ;;  %v683_v51 = vrot.slane %v681_v38, 1  ;;  %v1044_v52 = vpack.c.b16 %v1036_v40, %v1036_v40  ;;  %v1088_v54 = vshll.u32 %v2163_v39, 16  ;;  %v1679_v38 = vld [vmem:[%s2034_s6 + $0x68] sm:$0x1] }
  0x40   : > { %1187 = vrot.lane.b32.xlu2 %v1166_v56, %s1939_s7  ;;  %v736_v56 = vshll.u32 %v2166_v42, 16  ;;  %v307_v53 = vor.u32 %v306_v46, %v302_v45  ;;  %v311_v60 = vrot.slane %v309_v47, 1  ;;  %v1086_v62 = vshrl.u32 %v2163_v39, 16  ;;  %v1673_v46 = vld [vmem:[%s2034_s6 + $0x50] sm:$0x1]  ;;  %v2208_v47 = vld [vmem:[%s2034_s6 + $0x60] sm:$0xff] }
  0x41   : > { %v1090_v63 = vrot.slane %v1088_v54, 1  ;;  %v1093_v1 = vshll.u32 %v1044_v52, 16  ;;  %v734_v3 = vshrl.u32 %v2166_v42, 16  ;;  %v263_v6 = vunpack.c.l.b16 %v199_v58  ;;  %v2216_v58 = vld [vmem:[%s2034_s6 + $0x48] sm:$0xff] }
  0x42   : > { %v312_v12 = vsel %vm276_vm1, %v307_v53, %v311_v60  ;;  %v316_v17 = vshll.u32 %v2181_v5, 16  ;;  %v767_v20 = vrot.slane %v2140_v11, 1  ;;  %v768_v21 = vrot.slane %v2151_v24, 1 }
  0x43   : > { %v1095_v15 = vrot.slane %v1093_v1, 1  ;;  %v271_v16 = vpack.c.b16 %v263_v6, %v263_v6  ;;  %v314_v25 = vshrl.u32 %v2181_v5, 16  ;;  %v1170_v36 = vrot.slane %v2163_v39, 1  ;;  %v202_v6 = vld [vmem:[%s2034_s6 + $0x38] sm:$0x1] }
  0x44   : > { %747 = vrot.lane.b32.xlu1 %v672_v49, %s1940_s8  ;;  %v397_v49 = vrot.slane %v270_v35, 1  ;;  %v318_v26 = vrot.slane %v316_v17, 1  ;;  %v769_v30 = vsel %vm389_vm0, %v767_v20, %v768_v21  ;;  %v1171_v37 = vrot.slane %v1044_v52, 1 }
  0x45   : > { %375 = vrot.lane.b32.xlu0 %v300_v55, %s1940_s8  ;;  %v648_v55 = vpack.c.b16 %v640_v41, %v640_v41  ;;  %v321_v27 = vshll.u32 %v271_v16, 16  ;;  %v782_v40 = vrot.slane %v2166_v42, 1  ;;  %v1124_v60 = vshll.u32 %v2208_v47, 16 }
  0x46   : > { %v398_v61 = vsel %vm389_vm0, %v396_v48, %v397_v49  ;;  %v319_v24 = vor.u32 %v318_v26, %v314_v25  ;;  %v1039_v48 = vunpack.c.l.b16 %v1679_v38  ;;  %v400_v1 = vrot.slane %v271_v16, 1  ;;  %v2233_v16 = vld [vmem:[%s2034_s6 + $0x3c] sm:$0xff] }
  0x47   : > { %v741_v10 = vshll.u32 %v648_v55, 16  ;;  %v323_v35 = vrot.slane %v321_v27, 1  ;;  %v783_v41 = vrot.slane %v648_v55, 1  ;;  %v1037_v55 = vunpack.c.l.b16 %v1673_v46 }
  0x48   : > { %416 = vrot.lane.b32.xlu2 %v395_v14, %s1939_s7  ;;  %v1091_v14 = vor.u32 %v1090_v63, %v1086_v62  ;;  %v2218_v53 = vpack.c.b16 %v1039_v48, %v1039_v48  ;;  %v399_v63 = vrot.slane %v2181_v5, 1  ;;  %v264_v21 = vunpack.c.l.b16 %v202_v6 }
  0x49   : > { %v743_v19 = vrot.slane %v741_v10, 1  ;;  %v324_v49 = vsel %vm276_vm1, %v319_v24, %v323_v35  ;;  %v1100_v10 = vshll.u32 %v2216_v58, 16  ;;  %v1098_v26 = vshrl.u32 %v2216_v58, 16  ;;  %v1745_v24 = vld [vmem:[%s2526_s1] sm:$0x30] }
  0x4a   : > { %v1096_v23 = vsel %vm276_vm1, %v1091_v14, %v1095_v15  ;;  %v1122_v14 = vshrl.u32 %v2208_v47, 16  ;;  %v1126_v15 = vrot.slane %v1124_v60, 1  ;;  %v1129_v17 = vshll.u32 %v2218_v53, 16 }
  0x4b   : > { %v1102_v27 = vrot.slane %v1100_v10, 1 }
  0x4c   : > { %757 = vrot.lane.b32.xlu1 %v732_v7, %s1940_s8  ;;  %v684_v7 = vsel %vm276_vm1, %v679_v50, %v683_v51  ;;  %v1172_v50 = vsel %vm389_vm0, %v1170_v36, %v1171_v37  ;;  %v784_v51 = vsel %vm389_vm0, %v782_v40, %v783_v41  ;;  %v1127_v35 = vor.u32 %v1126_v15, %v1122_v14 }
  0x4d   : > { %787 = vrot.lane.b32.xlu0 %v766_v9, %s1939_s7  ;;  %v738_v9 = vrot.slane %v736_v56, 1  ;;  %v1131_v36 = vrot.slane %v1129_v17, 1  ;;  %v700_v40 = vshll.u32 %v2233_v16, 16  ;;  %v2252_v41 = vpack.c.b16 %v264_v21, %v264_v21  ;;  %v1682_v21 = vld [vmem:[%s2034_s6 + $0x74] sm:$0x1] }
  0x4e   : > { %v1103_v46 = vor.u32 %v1102_v27, %v1098_v26  ;;  %v1179_v14 = vrot.slane %v2208_v47, 1  ;;  %v1180_v15 = vrot.slane %v2218_v53, 1  ;;  %v1647_v27 = vld [vmem:[%s2526_s1 + $0x8] sm:$0xf]  ;;  %v1754_v53 = vld [vmem:[%s2526_s1 + $0x8] sm:$0x30] }
  0x4f   : > { %v739_v18 = vor.u32 %v738_v9, %v734_v3  ;;  %v1601_v3 = vld [vmem:[%s2034_s6 + $0x44] sm:$0x1] }
  0x50   : > { %1149 = vrot.lane.b32.xlu2 %v1084_v44, %s1940_s8  ;;  %v637_v20 = vunpack.c.l.b16 %v1601_v3  ;;  %v1181_v26 = vsel %vm389_vm0, %v1179_v14, %v1180_v15  ;;  %v2324_v14 = vld [vmem:[%s2034_s6 + $0x3c] sm:$0xff] }
  0x51   : > { %v744_v29 = vsel %vm276_vm1, %v739_v18, %v743_v19  ;;  %v401_v19 = vsel %vm389_vm0, %v399_v63, %v400_v1  ;;  %v333_v63 = vshll.u32 %v2252_v41, 16 }
  0x52   : > { %v2249_v38 = vpack.c.b16 %v637_v20, %v637_v20 }
  0x54   : > { %1189 = vrot.lane.b32.xlu1 %v1169_v31, %s1939_s7  ;;  %v2198_v31 = vld [vmem:[%s2034_s6 + $0x30] sm:$0xff] }
  0x55   : > { %797 = vrot.lane.b32.xlu0 %v781_v32, %s1939_s7  ;;  %v636_v32 = vunpack.c.l.b16 %v1598_v28  ;;  %v688_v44 = vshll.u32 %v2198_v31, 16  ;;  %v686_v52 = vshrl.u32 %v2198_v31, 16 }
  0x57   : > { %v644_v45 = vpack.c.b16 %v636_v32, %v636_v32  ;;  %v690_v54 = vrot.slane %v688_v44, 1 }
  0x58   : > { %377 = vrot.lane.b32.xlu2 %v312_v12, %s1940_s8  ;;  %v1045_v12 = vpack.c.b16 %v1037_v55, %v1037_v55  ;;  %v705_v55 = vshll.u32 %v2249_v38, 16 }
  0x59   : > { %v693_v56 = vshll.u32 %v644_v45, 16  ;;  %v771_v62 = vrot.slane %v644_v45, 1  ;;  %v1676_v45 = vld [vmem:[%s2034_s6 + $0x5c] sm:$0x1] }
  0x5a   : > { %v1105_v28 = vshll.u32 %v1045_v12, 16  ;;  %v1174_v32 = vrot.slane %v1045_v12, 1  ;;  %v1038_v60 = vunpack.c.l.b16 %v1676_v45  ;;  %v335_v12 = vrot.slane %v333_v63, 1 }
  0x5b   : > { %v695_v9 = vrot.slane %v693_v56, 1  ;;  %v702_v56 = vrot.slane %v700_v40, 1  ;;  %v773_v40 = vrot.slane %v2233_v16, 1 }
  0x5c   : > { %418 = vrot.lane.b32.xlu1 %v398_v61, %s1939_s7  ;;  %v770_v61 = vrot.slane %v2198_v31, 1  ;;  %v1107_v48 = vrot.slane %v1105_v28, 1  ;;  %v1719_v28 = vld [vmem:[%s2526_s1 + $0x10] sm:$0xf] }
  0x5d   : > { %749 = vrot.lane.b32.xlu0 %v684_v7, %s1940_s8  ;;  %v691_v7 = vor.u32 %v690_v54, %v686_v52  ;;  %v2261_v52 = vld [vmem:[%s2034_s6 + $0x54] sm:$0xff]  ;;  %v698_v54 = vshrl.u32 %v2233_v16, 16 }
  0x5e   : > { %v772_v18 = vsel %vm389_vm0, %v770_v61, %v771_v62  ;;  %v1108_v1 = vsel %vm276_vm1, %v1103_v46, %v1107_v48  ;;  %v1112_v3 = vshll.u32 %v2261_v52, 16  ;;  %v1110_v17 = vshrl.u32 %v2261_v52, 16  ;;  %v1604_v46 = vld [vmem:[%s2034_s6 + $0x50] sm:$0x1] }
  0x5f   : > { %v696_v25 = vsel %vm276_vm1, %v691_v7, %v695_v9  ;;  %v703_v6 = vor.u32 %v702_v56, %v698_v54  ;;  %v707_v7 = vrot.slane %v705_v55, 1  ;;  %v2271_v9 = vpack.c.b16 %v1038_v60, %v1038_v60  ;;  %v205_v60 = vld [vmem:[%s2034_s6 + $0x44] sm:$0x1] }
  0x60   : > { %789 = vrot.lane.b32.xlu2 %v769_v30, %s1939_s7  ;;  %v1173_v30 = vrot.slane %v2216_v58, 1  ;;  %v265_v15 = vunpack.c.l.b16 %v205_v60 }
  0x61   : > { %v1117_v20 = vshll.u32 %v2271_v9, 16 }
  0x64   : > { %1151 = vrot.lane.b32.xlu1 %v1096_v23, %s1940_s8  ;;  %v2236_v23 = vld [vmem:[%s2034_s6 + $0x30] sm:$0xff] }
  0x65   : > { %759 = vrot.lane.b32.xlu0 %v744_v29, %s1940_s8  ;;  %v1575_v29 = vld [vmem:[%s2526_s1] sm:$0xf]  ;;  %v328_v44 = vshll.u32 %v2236_v23, 16  ;;  %v326_v61 = vshrl.u32 %v2236_v23, 16  ;;  %v402_v48 = vrot.slane %v2236_v23, 1 }
  0x66   : > { %v1576_v37 = vor.u32 %v1745_v24, %v1575_v29  ;;  %v1648_v29 = vor.u32 %v1754_v53, %v1647_v27  ;;  %v2296_v24 = vld [vmem:[%s2034_s6 + $0x6c] sm:$0xff] }
  0x67   : > { %v330_v62 = vrot.slane %v328_v44, 1  ;;  %v774_v44 = vrot.slane %v2249_v38, 1  ;;  %v1134_v63 = vshrl.u32 %v2296_v24, 16 }
  0x68   : > { %799 = vrot.lane.b32.xlu2 %v784_v51, %s1939_s7  ;;  %v1132_v51 = vsel %vm276_vm1, %v1127_v35, %v1131_v36  ;;  %v1040_v35 = vunpack.c.l.b16 %v1682_v21  ;;  %v858_v45 = vsel %vm488_vm2, %v1648_v29, 0  ;;  %v340_v21 = vshll.u32 %v2324_v14, 16 }
  0x69   : > { %v331_v10 = vor.u32 %v330_v62, %v326_v61  ;;  %867 = vmatpush.bf16.msra.mxu1 %v858_v45  ;;  %v775_v55 = vsel %vm389_vm0, %v773_v40, %v774_v44  ;;  %v2315_v61 = vld [vmem:[%s2034_s6 + $0x48] sm:$0xff]  ;;  %v405_v40 = vrot.slane %v2324_v14, 1  ;;  %s170_s6 = sand.u32 1, %s1913_s10  }
  0x6a   : > { %v1048_v38 = vpack.c.b16 %v1040_v35, %v1040_v35  ;;  %v710_v53 = vshrl.u32 %v2315_v61, 16  ;;  %v342_v35 = vrot.slane %v340_v21, 1  ;;  %s1406_s30 = scalar_lea.sflag [#allocation4], %s170_s6 }
  0x6c   : > { %379 = vrot.lane.b32.xlu1 %v324_v49, %s1940_s8  ;;  %v490_v49 = vsel %vm488_vm2, %v1576_v37, 0  ;;  %v1119_v37 = vrot.slane %v1117_v20, 1 }
  0x6d   : > { %1191 = vrot.lane.b32.xlu0 %v1172_v50, %s1939_s7  ;;  %499 = vmatpush.bf16.msra.mxu0 %v490_v49  ;;  %v1175_v50 = vsel %vm389_vm0, %v1173_v30, %v1174_v32  ;;  %v1763_v30 = vld [vmem:[%s2526_s1 + $0x10] sm:$0x30] }
  0x6e   : > { %1765 = vmatpush.bf16.msra.mxu3 %v490_v49  ;;  %v1720_v36 = vor.u32 %v1763_v30, %v1719_v28  ;;  %v403_v49 = vrot.slane %v2252_v41, 1  ;;  %v638_v41 = vunpack.c.l.b16 %v1604_v46 }
  0x70   : > { %751 = vrot.lane.b32.xlu2 %v696_v25, %s1940_s8  ;;  %v336_v25 = vsel %vm276_vm1, %v331_v10, %v335_v12  ;;  %v404_v62 = vsel %vm389_vm0, %v402_v48, %v403_v49  ;;  %v1176_v10 = vrot.slane %v2261_v52, 1  ;;  %v1177_v12 = vrot.slane %v2271_v9, 1 }
  0x71   : > { %v273_v9 = vpack.c.b16 %v265_v15, %v265_v15 }
  0x72   : > { %1766 = vmatpush.bf16.msrb.mxu3 %v858_v45  ;;  %v1178_v27 = vsel %vm389_vm0, %v1176_v10, %v1177_v12 }
  0x73   : > { %v406_v44 = vrot.slane %v273_v9, 1 }
  0x74   : > { %791 = vrot.lane.b32.xlu1 %v772_v18, %s1939_s7  ;;  %v1114_v18 = vrot.slane %v1112_v3, 1  ;;  %v1141_v3 = vshll.u32 %v1048_v38, 16 }
  0x75   : > { %420 = vrot.lane.b32.xlu0 %v401_v19, %s1939_s7  ;;  %v708_v19 = vsel %vm276_vm1, %v703_v6, %v707_v7  ;;  %v1182_v6 = vrot.slane %v2296_v24, 1  ;;  %v1183_v7 = vrot.slane %v1048_v38, 1  ;;  %v407_v60 = vsel %vm389_vm0, %v405_v40, %v406_v44 }
  0x76   : > { %v1115_v32 = vor.u32 %v1114_v18, %v1110_v17  ;;  %v646_v17 = vpack.c.b16 %v638_v41, %v638_v41  ;;  %v712_v18 = vshll.u32 %v2315_v61, 16  ;;  %v1143_v20 = vrot.slane %v1141_v3, 1 }
  0x78   : > { %1153 = vrot.lane.b32.xlu2 %v1108_v1, %s1940_s8  ;;  %v1120_v56 = vsel %vm276_vm1, %v1115_v32, %v1119_v37  ;;  %v714_v28 = vrot.slane %v712_v18, 1  ;;  %v717_v29 = vshll.u32 %v646_v17, 16  ;;  %v338_v32 = vshrl.u32 %v2324_v14, 16 }
  0x7a   : > { %v715_v46 = vor.u32 %v714_v28, %v710_v53  ;;  %v719_v48 = vrot.slane %v717_v29, 1  ;;  %v343_v49 = vor.u32 %v342_v35, %v338_v32 }
  0x7c   : > { %1193 = vrot.lane.b32.xlu1 %v1175_v50, %s1939_s7  ;;  %v1136_v50 = vshll.u32 %v2296_v24, 16 }
  0x7d   : > { %1157 = vrot.lane.b32.xlu0 %v1132_v51, %s1940_s8  ;;  %v2308_v51 = vsel %vm488_vm2, %v1720_v36, 0  ;;  %v345_v36 = vshll.u32 %v273_v9, 16 }
  0x7e   : > { %1267 = vmatpush.bf16.msra.mxu2 %v2308_v51  ;;  %v1138_v1 = vrot.slane %v1136_v50, 1 }
  0x7f   : > { %v347_v50 = vrot.slane %v345_v36, 1 }
  0x80   : > { %1197 = vrot.lane.b32.xlu2 %v1181_v26, %s1939_s7  ;;  %v1184_v26 = vsel %vm389_vm0, %v1182_v6, %v1183_v7 }
  0x82   : > { %v374_v54 = vpop.permute.xlu2 %373 }
  0x83   : > { %v432_v37 = vsel %vm430_vm3, %v2041_v2, %v374_v54  ;;  %v720_v2 = vsel %vm276_vm1, %v715_v46, %v719_v48  ;;  %v348_v54 = vsel %vm276_vm1, %v343_v49, %v347_v50 }
  0x84   : > { %753 = vrot.lane.b32.xlu1 %v708_v19, %s1940_s8  ;;  %v1139_v19 = vor.u32 %v1138_v1, %v1134_v63  ;;  %v777_v63 = vrot.slane %v646_v17, 1 }
  0x85   : > { %381 = vrot.lane.b32.xlu0 %v336_v25, %s1940_s8 }
  0x86   : > { %v1144_v30 = vsel %vm276_vm1, %v1139_v19, %v1143_v20 }
  0x88   : > { %422 = vrot.lane.b32.xlu2 %v404_v62, %s1939_s7  ;;  %v776_v62 = vrot.slane %v2315_v61, 1 }
  0x8a   : > { %v746_v25 = vpop.permute.xlu2 %745  ;;  %v778_v10 = vsel %vm389_vm0, %v776_v62, %v777_v63 }
  0x8b   : > { %v802_v12 = vsel %vm430_vm3, %v2063_v34, %v746_v25 }
  0x8c   : > { %1155 = vrot.lane.b32.xlu1 %v1120_v56, %s1940_s8 }
  0x8d   : > { %793 = vrot.lane.b32.xlu0 %v775_v55, %s1939_s7 }
  0x90   : > { %1159 = vrot.lane.b32.xlu2 %v1144_v30, %s1940_s8 }
  0x92   : > { %v388_v56 = vpop.permute.xlu2 %387 }
  0x94   : > { %1199 = vrot.lane.b32.xlu1 %v1184_v26, %s1939_s7 }
  0x95   : > { %1195 = vrot.lane.b32.xlu0 %v1178_v27, %s1939_s7 }
  0x96   : > { %v427_v45 = vpop.permute.xlu1 %426 }
  0x97   : > { %v415_v38 = vpop.permute.xlu0 %414 }
  0x98   : > { %v449_v55 = vsel %vm447_vm4, %v432_v37, %v415_v38  ;;  %383 = vrot.lane.b32.xlu2 %v348_v54, %s1940_s8 }
  0x99   : > { %1577 = vmatmul.msk.bf16.vlgmr.msra.gmra.mxu0 %vm471_vm5, %v449_v55 }
  0x9a   : > { %v1188_v3 = vpop.permute.xlu2 %1187 }
  0x9c   : > { %424 = vrot.lane.b32.xlu1 %v407_v60, %s1939_s7 }
  0x9d   : > { %755 = vrot.lane.b32.xlu0 %v720_v2, %s1940_s8  ;;  %s1536_s8 = sshll.u32 %s170_s6, 7 }
  0x9e   : > { %v1186_v41 = vpop.permute.xlu1 %1185  ;;  %s2452_s17 = scalar_lea.vmem [#allocation3], %s1536_s8 }
  0x9f   : > { %v386_v1 = vpop.permute.xlu0 %385  ;;  %s1422_s28 = sshll.u32 %s2452_s17, 4  ;;  %s1423_s28 = int_to_ptr.vmem [resolvable:$true] %s1422_s28 }
  0xa0   : > { %v444_v6 = vsel %vm430_vm3, %v2037_v0, %v386_v1  ;;  %795 = vrot.lane.b32.xlu2 %v778_v10, %s1939_s7 }
  0xa1   : > { %v461_v7 = vsel %vm447_vm4, %v444_v6, %v427_v45 }
  0xa2   : > { %1583 = vmatmul.msk.bf16.vlgmr.msra.gmra.mxu3 %vm471_vm5, %v461_v7  ;;  %v417_v19 = vpop.permute.xlu2 %416 }
  0xa3   : > { %1767 = vmatpush.bf16.msra.mxu3 %v2308_v51  ;;  %v446_v51 = vsel %vm430_vm3, %v2085_v59, %v388_v56 }
  0xa6   : > { %v786_v15 = vpop.permute.xlu1 %785 }
  0xa7   : > { %v1146_v17 = vpop.permute.xlu0 %1145  ;;  %v818_v18 = vsel %vm447_vm4, %v802_v12, %v786_v15 }
  0xa8   : > { %v1202_v0 = vsel %vm430_vm3, %v2049_v13, %v1146_v17  ;;  %1649 = vmatmul.msk.bf16.vlgmr.msra.gmra.mxu1 %vm471_vm5, %v818_v18 }
  0xa9   : > { %v1218_v20 = vsel %vm447_vm4, %v1202_v0, %v1186_v41 }
  0xaa   : > { %1721 = vmatmul.msk.bf16.vlgmr.msra.gmra.mxu2 %vm471_vm5, %v1218_v20  ;;  %v1150_v25 = vpop.permute.xlu2 %1149 }
  0xae   : > { %v429_v21 = vpop.permute.xlu1 %428 }
  0xaf   : > { %v1148_v26 = vpop.permute.xlu0 %1147  ;;  %v463_v34 = vsel %vm447_vm4, %v446_v51, %v429_v21 }
  0xb0   : > { %v1204_v27 = vsel %vm430_vm3, %v2069_v43, %v1148_v26 }
  0xb1   : > { %v1220_v59 = vsel %vm447_vm4, %v1204_v27, %v1188_v3 }
  0xb2   : > { %1584 = vmatmul.msk.bf16.gmra.mxu3 %vm471_vm5, %v463_v34  ;;  %v378_v53 = vpop.permute.xlu2 %377 }
  0xb6   : > { %v748_v13 = vpop.permute.xlu1 %747 }
  0xb7   : > { %v376_v9 = vpop.permute.xlu0 %375  ;;  %v804_v32 = vsel %vm430_vm3, %v2090_v4, %v748_v13  ;;  %v436_v4 = vsel %vm430_vm3, %v2148_v22, %v378_v53 }
  0xb8   : > { %v434_v28 = vsel %vm430_vm3, %v2095_v8, %v376_v9  ;;  %v1206_v8 = vsel %vm430_vm3, %v2128_v57, %v1150_v25 }
  0xb9   : > { %v451_v29 = vsel %vm447_vm4, %v434_v28, %v417_v19 }
  0xba   : > { %1578 = vmatmul.msk.bf16.gmra.mxu0 %vm471_vm5, %v451_v29  ;;  %1722 = vmatmul.msk.bf16.gmra.mxu2 %vm471_vm5, %v1220_v59  ;;  %v790_v43 = vpop.permute.xlu2 %789 }
  0xbe   : > { %v758_v30 = vpop.permute.xlu1 %757 }
  0xbf   : > { %v788_v35 = vpop.permute.xlu0 %787  ;;  %v814_v40 = vsel %vm430_vm3, %v2111_v33, %v758_v30 }
  0xc0   : > { %v820_v36 = vsel %vm447_vm4, %v804_v32, %v788_v35 }
  0xc1   : > { %1650 = vmatmul.msk.bf16.gmra.mxu1 %vm471_vm5, %v820_v36 }
  0xc2   : > { %v800_v48 = vpop.permute.xlu2 %799 }
  0xc6   : > { %v1190_v37 = vpop.permute.xlu1 %1189 }
  0xc7   : > { %v798_v44 = vpop.permute.xlu0 %797  ;;  %v1222_v45 = vsel %vm447_vm4, %v1206_v8, %v1190_v37 }
  0xc8   : > { %v830_v46 = vsel %vm447_vm4, %v814_v40, %v798_v44 }
  0xc9   : > { %1655 = vmatmul.msk.bf16.vlgmr.msrb.gmra.mxu3 %vm471_vm5, %v830_v46 }
  0xca   : > { %1723 = vmatmul.msk.bf16.gmra.mxu2 %vm471_vm5, %v1222_v45  ;;  %v752_v56 = vpop.permute.xlu2 %751 }
  0xcb   : > { %v808_v1 = vsel %vm430_vm3, %v2198_v31, %v752_v56 }
  0xce   : > { %v419_v49 = vpop.permute.xlu1 %418 }
  0xcf   : > { %v750_v50 = vpop.permute.xlu0 %749  ;;  %v453_v57 = vsel %vm447_vm4, %v436_v4, %v419_v49 }
  0xd0   : > { %v806_v33 = vsel %vm430_vm3, %v2140_v11, %v750_v50  ;;  %1579 = vmatmul.msk.bf16.gmra.mxu0 %vm471_vm5, %v453_v57 }
  0xd1   : > { %v822_v38 = vsel %vm447_vm4, %v806_v33, %v790_v43 }
  0xd2   : > { %1651 = vmatmul.msk.bf16.gmra.mxu1 %vm471_vm5, %v822_v38  ;;  %v1154_v54 = vpop.permute.xlu2 %1153 }
  0xd6   : > { %v1152_v55 = vpop.permute.xlu1 %1151 }
  0xd7   : > { %v760_v60 = vpop.permute.xlu0 %759  ;;  %v1208_v11 = vsel %vm430_vm3, %v2163_v39, %v1152_v55  ;;  %v1210_v39 = vsel %vm430_vm3, %v2216_v58, %v1154_v54 }
  0xd8   : > { %v816_v2 = vsel %vm430_vm3, %v2166_v42, %v760_v60 }
  0xd9   : > { %v832_v22 = vsel %vm447_vm4, %v816_v2, %v800_v48 }
  0xda   : > { %1656 = vmatmul.msk.bf16.gmra.mxu3 %vm471_vm5, %v832_v22  ;;  %v1198_v6 = vpop.permute.xlu2 %1197 }
  0xde   : > { %v380_v41 = vpop.permute.xlu1 %379 }
  0xdf   : > { %v1192_v62 = vpop.permute.xlu0 %1191  ;;  %v438_v42 = vsel %vm430_vm3, %v2181_v5, %v380_v41 }
  0xe0   : > { %v1224_v63 = vsel %vm447_vm4, %v1208_v11, %v1192_v62 }
  0xe1   : > { %1724 = vmatmul.msk.bf16.gmra.mxu2 %vm471_vm5, %v1224_v63 }
  0xe2   : > { %v423_v5 = vpop.permute.xlu2 %422 }
  0xe6   : > { %v792_v3 = vpop.permute.xlu1 %791 }
  0xe7   : > { %v421_v7 = vpop.permute.xlu0 %420  ;;  %v824_v10 = vsel %vm447_vm4, %v808_v1, %v792_v3 }
  0xe8   : > { %v455_v12 = vsel %vm447_vm4, %v438_v42, %v421_v7  ;;  %1652 = vmatmul.msk.bf16.gmra.mxu1 %vm471_vm5, %v824_v10 }
  0xe9   : > { %1580 = vmatmul.msk.bf16.gmra.mxu0 %vm471_vm5, %v455_v12 }
  0xea   : > { %v1160_v21 = vpop.permute.xlu2 %1159 }
  0xeb   : > { %v1216_v13 = vsel %vm430_vm3, %v2296_v24, %v1160_v21 }
  0xee   : > { %v1194_v15 = vpop.permute.xlu1 %1193 }
  0xef   : > { %v1158_v17 = vpop.permute.xlu0 %1157  ;;  %v1226_v31 = vsel %vm447_vm4, %v1210_v39, %v1194_v15 }
  0xf0   : > { %v1214_v18 = vsel %vm430_vm3, %v2208_v47, %v1158_v17 }
  0xf1   : > { %v1230_v19 = vsel %vm447_vm4, %v1214_v18, %v1198_v6  ;;  %1725 = vmatmul.msk.bf16.gmra.mxu2 %vm471_vm5, %v1226_v31 }
  0xf2   : > { %1727 = vmatmul.msk.bf16.vlgmr.msra.gmra.mxu3 %vm471_vm5, %v1230_v19  ;;  %v384_v27 = vpop.permute.xlu2 %383 }
  0xf6   : > { %v754_v0 = vpop.permute.xlu1 %753 }
  0xf7   : > { %v382_v20 = vpop.permute.xlu0 %381  ;;  %v810_v47 = vsel %vm430_vm3, %v2233_v16, %v754_v0  ;;  %v442_v16 = vsel %vm430_vm3, %v2324_v14, %v384_v27 }
  0xf8   : > { %v440_v51 = vsel %vm430_vm3, %v2236_v23, %v382_v20 }
  0xf9   : > { %v457_v58 = vsel %vm447_vm4, %v440_v51, %v423_v5 }
  0xfa   : > { %1581 = vmatmul.msk.bf16.gmra.mxu0 %vm471_vm5, %v457_v58  ;;  %v796_v24 = vpop.permute.xlu2 %795 }
  0xfe   : > { %v1156_v26 = vpop.permute.xlu1 %1155 }
  0xff   : > { %v794_v34 = vpop.permute.xlu0 %793  ;;  %v1212_v23 = vsel %vm430_vm3, %v2261_v52, %v1156_v26 }
 0x100   : > { %v826_v25 = vsel %vm447_vm4, %v810_v47, %v794_v34 }
 0x101   : > { %1653 = vmatmul.msk.bf16.gmra.mxu1 %vm471_vm5, %v826_v25 }
 0x106   : > { %v1200_v9 = vpop.permute.xlu1 %1199 }
 0x107   : > { %v1196_v53 = vpop.permute.xlu0 %1195  ;;  %v1232_v28 = vsel %vm447_vm4, %v1216_v13, %v1200_v9 }
 0x108   : > { %v1228_v29 = vsel %vm447_vm4, %v1212_v23, %v1196_v53  ;;  %1728 = vmatmul.msk.bf16.gmra.mxu3 %vm471_vm5, %v1232_v28 }
 0x109   : > { %1726 = vmatmul.msk.bf16.gmra.mxu2 %vm471_vm5, %v1228_v29 }
 0x10e   : > { %v425_v59 = vpop.permute.xlu1 %424 }
 0x10f   : > { %v756_v30 = vpop.permute.xlu0 %755  ;;  %v459_v32 = vsel %vm447_vm4, %v442_v16, %v425_v59 }
 0x110   : > { %v812_v52 = vsel %vm430_vm3, %v2315_v61, %v756_v30  ;;  %1582 = vmatmul.msk.bf16.gmra.mxu0 %vm471_vm5, %v459_v32 }
 0x111   : > { %v828_v35 = vsel %vm447_vm4, %v812_v52, %v796_v24 }
 0x112   : > { %1654 = vmatmul.msk.bf16.gmra.mxu1 %vm471_vm5, %v828_v35 }
 0x116   : > { %v501_v8 = vpop.f32.mrf.mxu0 }
 0x11e   : > { %v503_v61 = vpop.f32.mrf.mxu0 }
 0x125   : > { %v869_v43 = vpop.f32.mrf.mxu1  ;;  %v2445_v36 = vpop.f32.mrf.mxu3 }
 0x126   : > { %v925_v14 = vadd.f32 %v869_v43, %v501_v8 }
 0x12d   : > { %v1269_v37 = vpop.f32.mrf.mxu2  ;;  %v871_v45 = vpop.f32.mrf.mxu1 }
 0x12e   : > { %v1325_v40 = vadd.f32 %v1269_v37, %v925_v14  ;;  %v2450_v46 = vpop.f32.mrf.mxu3  ;;  %v926_v48 = vadd.f32 %v871_v45, %v503_v61 }
 0x130   : > { %v1373_v44 = vmax.f32 %v1325_v40, 0.0 }
 0x132   : > { %1389 = vst [vmem:[%s2452_s17] sm:$0xff] %v1373_v44 }
 0x135   : > { %v1271_v4 = vpop.f32.mrf.mxu2 }
 0x136   : > { %v1326_v49 = vadd.f32 %v1271_v4, %v926_v48  ;;  %v2456_v33 = vpop.f32.mrf.mxu3 }
 0x137   : > { %v506_v57 = vpop.f32.mrf.mxu0 }
 0x138   : > { %v1374_v50 = vmax.f32 %v1326_v49, 0.0 }
 0x13a   : > { %1390 = vst [vmem:[%s2452_s17 + $0x8] sm:$0xff] %v1374_v50 }
 0x13d   : > { %v1274_v38 = vpop.f32.mrf.mxu2 }
 0x13e   : > { %v874_v56 = vpop.f32.mrf.mxu1  ;;  %v2459_v41 = vpop.f32.mrf.mxu3 }
 0x13f   : > { %v927_v55 = vadd.f32 %v874_v56, %v506_v57  ;;  %v508_v22 = vpop.f32.mrf.mxu0 }
 0x141   : > { %v1327_v60 = vadd.f32 %v1274_v38, %v927_v55 }
 0x143   : > { %v1375_v2 = vmax.f32 %v1327_v60, 0.0 }
 0x145   : > { %1391 = vst [vmem:[%s2452_s17 + $0x10] sm:$0xff] %v1375_v2  ;;  %v1276_v54 = vpop.f32.mrf.mxu2 }
 0x146   : > { %v876_v11 = vpop.f32.mrf.mxu1 }
 0x147   : > { %v928_v62 = vadd.f32 %v876_v11, %v508_v22 }
 0x149   : > { %v1328_v63 = vadd.f32 %v1276_v54, %v928_v62 }
 0x14b   : > { %v1376_v1 = vmax.f32 %v1328_v63, 0.0 }
 0x14c   : > { %v899_v6 = vpop.f32.mrf.mxu3 }
 0x14d   : > { %1392 = vst [vmem:[%s2452_s17 + $0x18] sm:$0xff] %v1376_v1  ;;  %v511_v3 = vpop.f32.mrf.mxu0  ;;  %v1279_v42 = vpop.f32.mrf.mxu2  ;;  %v937_v29 = vadd.f32 %v899_v6, %v2445_v36 }
 0x14f   : > { %v879_v7 = vpop.f32.mrf.mxu1 }
 0x150   : > { %v929_v10 = vadd.f32 %v879_v7, %v511_v3 }
 0x152   : > { %v1329_v12 = vadd.f32 %v1279_v42, %v929_v10 }
 0x154   : > { %v1377_v39 = vmax.f32 %v1329_v12, 0.0  ;;  %v901_v18 = vpop.f32.mrf.mxu3 }
 0x155   : > { %v513_v15 = vpop.f32.mrf.mxu0  ;;  %v1281_v5 = vpop.f32.mrf.mxu2  ;;  %v938_v32 = vadd.f32 %v901_v18, %v2450_v46 }
 0x156   : > { %1393 = vst [vmem:[%s2452_s17 + $0x20] sm:$0xff] %v1377_v39 }
 0x157   : > { %v881_v17 = vpop.f32.mrf.mxu1 }
 0x158   : > { %v930_v31 = vadd.f32 %v881_v17, %v513_v15 }
 0x15a   : > { %v1330_v19 = vadd.f32 %v1281_v5, %v930_v31 }
 0x15c   : > { %v1378_v0 = vmax.f32 %v1330_v19, 0.0 }
 0x15d   : > { %v904_v20 = vpop.f32.mrf.mxu3 }
 0x15e   : > { %1394 = vst [vmem:[%s2452_s17 + $0x28] sm:$0xff] %v1378_v0  ;;  %v939_v46 = vadd.f32 %v904_v20, %v2456_v33 }
 0x164   : > { %v1284_v58 = vpop.f32.mrf.mxu2 }
 0x165   : > { %v884_v51 = vpop.f32.mrf.mxu1  ;;  %v906_v25 = vpop.f32.mrf.mxu3 }
 0x166   : > { %v516_v21 = vpop.f32.mrf.mxu0  ;;  %v940_v22 = vadd.f32 %v906_v25, %v2459_v41 }
 0x167   : > { %v931_v26 = vadd.f32 %v884_v51, %v516_v21 }
 0x169   : > { %v1331_v47 = vadd.f32 %v1284_v58, %v931_v26 }
 0x16b   : > { %v1379_v34 = vmax.f32 %v1331_v47, 0.0 }
 0x16c   : > { %v1286_v23 = vpop.f32.mrf.mxu2 }
 0x16d   : > { %1395 = vst [vmem:[%s2452_s17 + $0x30] sm:$0xff] %v1379_v34  ;;  %v886_v27 = vpop.f32.mrf.mxu1 }
 0x16e   : > { %v518_v13 = vpop.f32.mrf.mxu0 }
 0x16f   : > { %v932_v9 = vadd.f32 %v886_v27, %v518_v13 }
 0x171   : > { %v1332_v53 = vadd.f32 %v1286_v23, %v932_v9 }
 0x173   : > { %v1380_v28 = vmax.f32 %v1332_v53, 0.0 }
 0x174   : > { %v1289_v52 = vpop.f32.mrf.mxu2 }
 0x175   : > { %1396 = vst [vmem:[%s2452_s17 + $0x38] sm:$0xff] %v1380_v28  ;;  %v1299_v16 = vpop.f32.mrf.mxu3 }
 0x176   : > { %v1337_v59 = vadd.f32 %v1299_v16, %v937_v29 }
 0x177   : > { %v521_v30 = vpop.f32.mrf.mxu0 }
 0x178   : > { %v1385_v24 = vmax.f32 %v1337_v59, 0.0 }
 0x17a   : > { %1401 = vst [vmem:[%s2452_s17 + $0x60] sm:$0xff] %v1385_v24 }
 0x17c   : > { %v1291_v61 = vpop.f32.mrf.mxu2 }
 0x17d   : > { %v1301_v35 = vpop.f32.mrf.mxu3 }
 0x17e   : > { %v1338_v43 = vadd.f32 %v1301_v35, %v938_v32  ;;  %v889_v8 = vpop.f32.mrf.mxu1 }
 0x17f   : > { %v933_v14 = vadd.f32 %v889_v8, %v521_v30  ;;  %v523_v44 = vpop.f32.mrf.mxu0 }
 0x180   : > { %v1386_v37 = vmax.f32 %v1338_v43, 0.0 }
 0x181   : > { %v1333_v40 = vadd.f32 %v1289_v52, %v933_v14 }
 0x182   : > { %1402 = vst [vmem:[%s2452_s17 + $0x68] sm:$0xff] %v1386_v37 }
 0x183   : > { %v1381_v36 = vmax.f32 %v1333_v40, 0.0 }
 0x185   : > { %1397 = vst [vmem:[%s2452_s17 + $0x40] sm:$0xff] %v1381_v36 }
 0x186   : > { %v891_v45 = vpop.f32.mrf.mxu1 }
 0x187   : > { %v934_v48 = vadd.f32 %v891_v45, %v523_v44 }
 0x189   : > { %v1334_v4 = vadd.f32 %v1291_v61, %v934_v48 }
 0x18b   : > { %v1382_v49 = vmax.f32 %v1334_v4, 0.0  ;;  %v1304_v50 = vpop.f32.mrf.mxu3 }
 0x18c   : > { %v1339_v57 = vadd.f32 %v1304_v50, %v939_v46  ;;  %v1294_v55 = vpop.f32.mrf.mxu2 }
 0x18d   : > { %1398 = vst [vmem:[%s2452_s17 + $0x48] sm:$0xff] %v1382_v49  ;;  %v526_v38 = vpop.f32.mrf.mxu0 }
 0x18e   : > { %v1387_v56 = vmax.f32 %v1339_v57, 0.0 }
 0x18f   : > { %v894_v60 = vpop.f32.mrf.mxu1 }
 0x190   : > { %1403 = vst [vmem:[%s2452_s17 + $0x70] sm:$0xff] %v1387_v56  ;;  %v935_v2 = vadd.f32 %v894_v60, %v526_v38 }
 0x192   : > { %v1335_v54 = vadd.f32 %v1294_v55, %v935_v2 }
 0x193   : > { %v1306_v33 = vpop.f32.mrf.mxu3 }
 0x194   : > { %v1383_v11 = vmax.f32 %v1335_v54, 0.0  ;;  %v1340_v62 = vadd.f32 %v1306_v33, %v940_v22  ;;  %v1296_v41 = vpop.f32.mrf.mxu2 }
 0x195   : > { %v528_v63 = vpop.f32.mrf.mxu0 }
 0x196   : > { %1399 = vst [vmem:[%s2452_s17 + $0x50] sm:$0xff] %v1383_v11  ;;  %v1388_v1 = vmax.f32 %v1340_v62, 0.0 }
 0x197   : > { %v896_v3 = vpop.f32.mrf.mxu1 }
 0x198   : > { %1404 = vst [vmem:[%s2452_s17 + $0x78] sm:$0xff] %v1388_v1  ;;  %v936_v6 = vadd.f32 %v896_v3, %v528_v63 }
 0x19a   : > { %v1336_v42 = vadd.f32 %v1296_v41, %v936_v6 }
 0x19c   : > { %v1384_v7 = vmax.f32 %v1336_v42, 0.0 }
 0x19e   : > { %1400 = vst [vmem:[%s2452_s17 + $0x58] sm:$0xff] %v1384_v7 }
 0x19f   : > { %1870 = shalt.err (!%p1867_p6)
}
 0x1a0   : > { %s1941_s6 = smov 128  }
 0x1a1   : > { %1769 = dma.vmem_to_hbm [thread:$0]  (%p2008_p3), %s1423_s28, 2048, %s1425_s29, %s1406_s30, %s1941_s6, %s1941_s6, %s1939_s7  }
 0x1a2 PF: > { %p1775_p7 = scmp.ge.s32.totalorder %s1937_s16, 2  ;;  %s1439_s17 = sand.u32 1, %s1909_s9  }
 0x1a3   : > { %s1440_s25 = scalar_lea.sflag [#allocation4], %s1439_s17 }
 0x1a4   : > { %p1772_p9 = pnand %p1775_p7, %p2017_p8 }
 0x1a6   : > { %p1773_p10 = pneg %p1772_p9 }
 0x1a8   : > { %1904 = dma.done.wait (%p1773_p10), %s1440_s25, 2048  }
 0x1a9   : > { %1906 = vsyncadd (%p1773_p10), %s1440_s25, 4294965248  ;;  %s15_s16 = sadd.s32 1, %s1937_s16   ;;  %s2530_s9 = smov %s1913_s10 }
 0x1aa   : > { %p12_p11 = scmp.ge.s32.totalorder %s15_s16, 6   ;;  %s2531_s10 = smov %s1917_s11 }
 0x1ab   : > { %s2532_s11 = smov %s2026_s27  ;;  %s2533_s12 = smov %s1929_s14 }
 0x1ac   : > { %s2534_s13 = smov %s1933_s15  ;;  %s2535_s14 = smov %s2538_s19 }
 0x1ad   : > { %s2536_s15 = smov %s2542_s20  ;;  %14 = sbr.rel (!%p12_p11) target bundleno = 5 (0x5), region = 71 }
 0x1b2   :  { %1446 = vsyncpa [#allocation4], 1 }
 0x1b3   :  { %1448 = vsyncpa [#allocation4 + $0x1], 1 }

</bundles_post_ra>
